<compile_context>
chip_gen: v5e
topology: v5e:2x2
jax: 0.10.0
libtpu: 0.0.40
codegen_flags: <defaults>
</compile_context>

<pallas_src>
import jax
import jax.numpy as jnp
from jax.experimental import pallas as pl
from jax.experimental.pallas import tpu as pltpu


_LANE = 128      # batch (lane axis) is padded to a multiple of the 128-lane width
_TILE_B = 4096   # lane-axis (batch) tile used only for very large rollout batches


def _make_mlp_kernel(num_hidden):
    """Fused whole-MLP kernel in feature-major layout: x is (features, batch)."""

    def kernel(*refs):
        x_ref = refs[0]
        out_ref = refs[-1]
        p = refs[1:-1]  # (w0, b0, w1, b1, ..., w_out, b_out), all VMEM blocks

        x = x_ref[...]                                       # (in_size, B)
        for i in range(num_hidden):
            w = p[2 * i][...]                                # (out, in)  PyTorch layout
            b = p[2 * i + 1][...]                            # (out, 1)
            x = jnp.maximum(
                jnp.dot(w, x, preferred_element_type=jnp.float32) + b, 0.0
            )
        wo = p[-2][...]
        bo = p[-1][...]
        out_ref[...] = jnp.tanh(
            jnp.dot(wo, x, preferred_element_type=jnp.float32) + bo
        )

    return kernel


def prepare_params(params, dtype=jnp.float32):
    """One-time layout prep (hoisted out of the per-call hot path).

    params: list of (W, b) with W in PyTorch (out, in) layout.
    Weights are kept as-is (the kernel computes W @ x with batch on the lane
    axis, so no transpose is needed); biases become (out, 1) columns so they
    broadcast along the batch/lane axis.
    """
    flat = []
    for w, b in params:
        flat.append(jnp.asarray(w, dtype))
        flat.append(jnp.asarray(b, dtype).reshape(-1, 1))
    return tuple(flat)


def agent_forward_pallas(ob, flat_params, *, tile_b=_TILE_B):
    """Batched Agent.forward. ob: (batch, in_size) f32 -> (batch, out_size) f32."""
    num_hidden = len(flat_params) // 2 - 1
    batch, in_size = ob.shape
    out_size = flat_params[-2].shape[0]

    # Batch lives on the lane axis: pad to a 128 multiple.  Anything up to
    # tile_b columns is a single grid step (one block = whole problem); larger
    # rollout batches stream tile_b-column blocks while the weights stay
    # VMEM-resident (constant index_maps).
    pad_b = max(_LANE, ((batch + _LANE - 1) // _LANE) * _LANE)
    if pad_b <= tile_b:
        tile = pad_b
    else:
        tile = tile_b
        pad_b = ((pad_b + tile_b - 1) // tile_b) * tile_b
    grid_b = pad_b // tile

    x_t = ob.T                                               # (in_size, batch)
    if pad_b != batch:
        x_t = jnp.pad(x_t, ((0, 0), (0, pad_b - batch)))     # zero-pad lanes

    vmem = pltpu.MemorySpace.VMEM
    in_specs = [pl.BlockSpec((in_size, tile), lambda i: (0, i), memory_space=vmem)]
    for arr in flat_params:
        # Constant (0, 0) block -> DMA'd once, VMEM-resident across grid steps.
        in_specs.append(
            pl.BlockSpec(arr.shape, lambda i: (0, 0), memory_space=vmem)
        )
    out_spec = pl.BlockSpec((out_size, tile), lambda i: (0, i), memory_space=vmem)

    out_t = pl.pallas_call(
        _make_mlp_kernel(num_hidden),
        out_shape=jax.ShapeDtypeStruct((out_size, pad_b), jnp.float32),
        grid=(grid_b,),
        in_specs=in_specs,
        out_specs=out_spec,
        compiler_params=pltpu.CompilerParams(
            # Inert for grid=(1,); only shards across v7x's 2 TCs once the
            # lane-tiled grid is big enough to amortize per-core launch.
            dimension_semantics=("parallel",),
        ),
    )(x_t, *flat_params)
    return out_t[:, :batch].T


def agent_forward_ref(ob, params):
    x = ob
    for w, b in params[:-1]:
        x = jnp.maximum(x @ w.T + b, 0.0)
    wo, bo = params[-1]
    return jnp.tanh(x @ wo.T + bo)


def init_agent_params(key, input_size, layers, output_size):
    """Deterministic PyTorch-Linear-like init: U(-1/sqrt(fan_in), 1/sqrt(fan_in))."""
    params = []
    in_size = input_size
    sizes = list(layers) + [output_size]
    for size in sizes:
        key, kw, kb = jax.random.split(key, 3)
        bound = 1.0 / jnp.sqrt(jnp.float32(in_size))
        w = jax.random.uniform(kw, (size, in_size), jnp.float32, -bound, bound)
        b = jax.random.uniform(kb, (size,), jnp.float32, -bound, bound)
        params.append((w, b))
        in_size = size
    return params


if __name__ == "__main__":
    # game.input_size=16, game.layers=[32, 32], game.output_size=8
    key = jax.random.PRNGKey(0)
    k_ob, k_ob2, k_param = jax.random.split(key, 3)

    input_size, layers, output_size = 16, [32, 32], 8
    params = init_agent_params(k_param, input_size, layers, output_size)
    flat = prepare_params(params)          # one-time layout prep (hoisted)

    fwd = jax.jit(agent_forward_pallas)    # cached per-shape; no per-call retrace

    # 1) original toy shape (batch=8): lanes padded to 128, single grid step.
    ob = jax.random.normal(k_ob, (8, input_size), jnp.float32)
    ac = jax.block_until_ready(fwd(ob, flat))
    ac_ref = agent_forward_ref(ob, params)
    assert ac.shape == (8, output_size)
    assert jnp.allclose(ac, ac_ref, atol=1e-5, rtol=1e-5), "mismatch (batch=8)"

    # 2) batched rollout shape (batch=384 = 3*128): still ONE grid step — the
    #    whole batch is a single lane-dense block (per-step overhead paid once).
    ob_big = jax.random.normal(k_ob2, (384, input_size), jnp.float32)
    ac_big = jax.block_until_ready(fwd(ob_big, flat))
    ac_big_ref = agent_forward_ref(ob_big, params)
    assert ac_big.shape == (384, output_size)
    assert jnp.allclose(ac_big, ac_big_ref, atol=1e-5, rtol=1e-5), "mismatch (batch=384)"

    # 3) exercise the large-batch tiled path (forced tiny tile so the grid has
    #    2 steps with VMEM-resident weights across them).
    ac_tiled = jax.block_until_ready(agent_forward_pallas(ob_big, flat, tile_b=256))
    assert ac_tiled.shape == (384, output_size)
    assert jnp.allclose(ac_tiled, ac_big_ref, atol=1e-5, rtol=1e-5), "mismatch (tiled)"

    # TODO(synk): the optional `sgn` surrogate-loss path calls an external SGN
    # network object and is not part of the Agent's own parameters; only the
    # (ac, None) branch is implemented.  OrnsteinUhlenbeck action noise and
    # gym env plumbing are host-side and out of scope for the kernel.
    print("KERNEL_OK")
</pallas_src>

<mosaic_0001>
module attributes {stable_mosaic.version = 11 : i64} {
  func.func @kernel(%arg0: i32, %arg1: memref<16x128xf32, #tpu.memory_space<vmem>>, %arg2: memref<32x16xf32, #tpu.memory_space<vmem>>, %arg3: memref<32x1xf32, #tpu.memory_space<vmem>>, %arg4: memref<32x32xf32, #tpu.memory_space<vmem>>, %arg5: memref<32x1xf32, #tpu.memory_space<vmem>>, %arg6: memref<8x32xf32, #tpu.memory_space<vmem>>, %arg7: memref<8x1xf32, #tpu.memory_space<vmem>>, %arg8: memref<8x128xf32, #tpu.memory_space<vmem>>) attributes {dimension_semantics = [#tpu.dimension_semantics<parallel>], iteration_bounds = array<i64: 1>, scalar_prefetch = 0 : i64, scratch_operands = 0 : i64, tpu.core_type = #tpu.core_type<tc>, window_params = [{transform_indices = @transform_0, window_bounds = array<i64: 16, 128>}, {pipeline_mode = #tpu.pipeline_mode<synchronous>, transform_indices = @transform_1, window_bounds = array<i64: 32, 16>}, {pipeline_mode = #tpu.pipeline_mode<synchronous>, transform_indices = @transform_2, window_bounds = array<i64: 32, 1>}, {pipeline_mode = #tpu.pipeline_mode<synchronous>, transform_indices = @transform_3, window_bounds = array<i64: 32, 32>}, {pipeline_mode = #tpu.pipeline_mode<synchronous>, transform_indices = @transform_4, window_bounds = array<i64: 32, 1>}, {pipeline_mode = #tpu.pipeline_mode<synchronous>, transform_indices = @transform_5, window_bounds = array<i64: 8, 32>}, {pipeline_mode = #tpu.pipeline_mode<synchronous>, transform_indices = @transform_6, window_bounds = array<i64: 8, 1>}, {transform_indices = @transform_7, window_bounds = array<i64: 8, 128>}]} {
    %c0 = arith.constant 0 : index
    %c0_0 = arith.constant 0 : index
    %0 = vector.load %arg1[%c0, %c0_0] : memref<16x128xf32, #tpu.memory_space<vmem>>, vector<16x128xf32>
    %c0_1 = arith.constant 0 : index
    %c0_2 = arith.constant 0 : index
    %1 = vector.load %arg2[%c0_1, %c0_2] : memref<32x16xf32, #tpu.memory_space<vmem>>, vector<32x16xf32>
    %c0_3 = arith.constant 0 : index
    %c0_4 = arith.constant 0 : index
    %2 = vector.load %arg3[%c0_3, %c0_4] : memref<32x1xf32, #tpu.memory_space<vmem>>, vector<32x1xf32>
    %cst = arith.constant dense<0.000000e+00> : vector<32x128xf32>
    %3 = tpu.matmul %1, %0, %cst {dimension_numbers = #tpu.dot_dimension_numbers<[1], [0], [0], [1], [0, 0, 1, 1], [], []>} : vector<32x16xf32>, vector<16x128xf32>, vector<32x128xf32> -> vector<32x128xf32>
    %4 = vector.broadcast %2 : vector<32x1xf32> to vector<32x128xf32>
    %5 = arith.addf %3, %4 : vector<32x128xf32>
    %cst_5 = arith.constant 0.000000e+00 : f32
    %6 = vector.broadcast %cst_5 : f32 to vector<32x128xf32>
    %7 = arith.maximumf %5, %6 : vector<32x128xf32>
    %c0_6 = arith.constant 0 : index
    %c0_7 = arith.constant 0 : index
    %8 = vector.load %arg4[%c0_6, %c0_7] : memref<32x32xf32, #tpu.memory_space<vmem>>, vector<32x32xf32>
    %c0_8 = arith.constant 0 : index
    %c0_9 = arith.constant 0 : index
    %9 = vector.load %arg5[%c0_8, %c0_9] : memref<32x1xf32, #tpu.memory_space<vmem>>, vector<32x1xf32>
    %cst_10 = arith.constant dense<0.000000e+00> : vector<32x128xf32>
    %10 = tpu.matmul %8, %7, %cst_10 {dimension_numbers = #tpu.dot_dimension_numbers<[1], [0], [0], [1], [0, 0, 1, 1], [], []>} : vector<32x32xf32>, vector<32x128xf32>, vector<32x128xf32> -> vector<32x128xf32>
    %11 = vector.broadcast %9 : vector<32x1xf32> to vector<32x128xf32>
    %12 = arith.addf %10, %11 : vector<32x128xf32>
    %cst_11 = arith.constant 0.000000e+00 : f32
    %13 = vector.broadcast %cst_11 : f32 to vector<32x128xf32>
    %14 = arith.maximumf %12, %13 : vector<32x128xf32>
    %c0_12 = arith.constant 0 : index
    %c0_13 = arith.constant 0 : index
    %15 = vector.load %arg6[%c0_12, %c0_13] : memref<8x32xf32, #tpu.memory_space<vmem>>, vector<8x32xf32>
    %c0_14 = arith.constant 0 : index
    %c0_15 = arith.constant 0 : index
    %16 = vector.load %arg7[%c0_14, %c0_15] : memref<8x1xf32, #tpu.memory_space<vmem>>, vector<8x1xf32>
    %cst_16 = arith.constant dense<0.000000e+00> : vector<8x128xf32>
    %17 = tpu.matmul %15, %14, %cst_16 {dimension_numbers = #tpu.dot_dimension_numbers<[1], [0], [0], [1], [0, 0, 1, 1], [], []>} : vector<8x32xf32>, vector<32x128xf32>, vector<8x128xf32> -> vector<8x128xf32>
    %18 = vector.broadcast %16 : vector<8x1xf32> to vector<8x128xf32>
    %19 = arith.addf %17, %18 : vector<8x128xf32>
    %20 = math.tanh %19 : vector<8x128xf32>
    %c0_17 = arith.constant 0 : index
    %c0_18 = arith.constant 0 : index
    %21 = vector.load %arg8[%c0_17, %c0_18] : memref<8x128xf32, #tpu.memory_space<vmem>>, vector<8x128xf32>
    tpu.vector_store %arg8[%c0_17, %c0_18], %20 {strides = array<i32>} : memref<8x128xf32, #tpu.memory_space<vmem>>, vector<8x128xf32>,
    return
  }
  func.func @transform_0(%arg0: i32) -> (i32, i32) {
    %c0_i32 = arith.constant 0 : i32
    %c0_i32_0 = arith.constant 0 : i32
    return %c0_i32, %arg0 : i32, i32
  }
  func.func @transform_1(%arg0: i32) -> (i32, i32) {
    %c0_i32 = arith.constant 0 : i32
    %c0_i32_0 = arith.constant 0 : i32
    %c0_i32_1 = arith.constant 0 : i32
    return %c0_i32, %c0_i32_0 : i32, i32
  }
  func.func @transform_2(%arg0: i32) -> (i32, i32) {
    %c0_i32 = arith.constant 0 : i32
    %c0_i32_0 = arith.constant 0 : i32
    %c0_i32_1 = arith.constant 0 : i32
    return %c0_i32, %c0_i32_0 : i32, i32
  }
  func.func @transform_3(%arg0: i32) -> (i32, i32) {
    %c0_i32 = arith.constant 0 : i32
    %c0_i32_0 = arith.constant 0 : i32
    %c0_i32_1 = arith.constant 0 : i32
    return %c0_i32, %c0_i32_0 : i32, i32
  }
  func.func @transform_4(%arg0: i32) -> (i32, i32) {
    %c0_i32 = arith.constant 0 : i32
    %c0_i32_0 = arith.constant 0 : i32
    %c0_i32_1 = arith.constant 0 : i32
    return %c0_i32, %c0_i32_0 : i32, i32
  }
  func.func @transform_5(%arg0: i32) -> (i32, i32) {
    %c0_i32 = arith.constant 0 : i32
    %c0_i32_0 = arith.constant 0 : i32
    %c0_i32_1 = arith.constant 0 : i32
    return %c0_i32, %c0_i32_0 : i32, i32
  }
  func.func @transform_6(%arg0: i32) -> (i32, i32) {
    %c0_i32 = arith.constant 0 : i32
    %c0_i32_0 = arith.constant 0 : i32
    %c0_i32_1 = arith.constant 0 : i32
    return %c0_i32, %c0_i32_0 : i32, i32
  }
  func.func @transform_7(%arg0: i32) -> (i32, i32) {
    %c0_i32 = arith.constant 0 : i32
    %c0_i32_0 = arith.constant 0 : i32
    return %c0_i32, %arg0 : i32, i32
  }
}

</mosaic_0001>

<bundles_post_ra>
// kernel: agent_forward_pallas.1
= control target key start
LH: loop header
LB: loop body
LE: loop exit
PB: predicated region body
PF: predicated region fallthrough
CT: control target
= control target key end

     0   :  { %v237_v2 = vmov 0   ;;  %vm56_vm0 = vcmask 130048   ;;  %vm130_vm1 = vcmask 261120   ;;  %s350_s0 = inlined_call_operand.vmem [shape: f32[16,128], index: 0, kind: input, shape index: {}]   ;;  %s351_s1 = inlined_call_operand.vmem [shape: f32[32,16], index: 1, kind: input, shape index: {}]   ;;  %s352_s2 = inlined_call_operand.vmem [shape: f32[32,1], index: 2, kind: input, shape index: {}]   ;;  %s353_s4 = inlined_call_operand.vmem [shape: f32[32,1], index: 4, kind: input, shape index: {}]   ;;  %s354_s6 = inlined_call_operand.vmem [shape: f32[8,1], index: 6, kind: input, shape index: {}]   ;;  %s355_s3 = inlined_call_operand.vmem [shape: f32[32,32], index: 3, kind: input, shape index: {}]   ;;  %s356_s5 = inlined_call_operand.vmem [shape: f32[8,32], index: 5, kind: input, shape index: {}]   ;;  %s357_s7 = inlined_call_operand.vmem [shape: f32[8,128], index: 7, kind: output, shape index: {}]  }
   0x1   :  { %v27_v0 = vld [vmem:[%s350_s0 + $0x8] sm:$0xff]  ;;  %v26_v1 = vld [vmem:[%s350_s0] sm:$0xff]  ;;  %233 = vset.pattern.permute.xlu1 %v237_v2  ;;  %232 = vset.pattern.permute.xlu0 %v237_v2  ;;  %v35_v4 = vld [vmem:[%s352_s2 + $0x18] sm:$0xff] }
   0x2   :  { %83 = vmatpush.msra.mxu0 %v27_v0  ;;  %v28_v3 = vld [vmem:[%s351_s1] sm:$0xff]  ;;  %v33_v5 = vld [vmem:[%s352_s2 + $0x8] sm:$0xff]  ;;  %221 = vmatpush.msra.mxu1 %v27_v0  ;;  %v31_v6 = vld [vmem:[%s351_s1 + $0x18] sm:$0xff] }
   0x3   :  { %53 = vperm.xlu0 %232, %v35_v4   ;;  %43 = vperm.xlu1 %233, %v33_v5   ;;  %v34_v7 = vld [vmem:[%s352_s2 + $0x10] sm:$0xff]  ;;  %v32_v8 = vld [vmem:[%s352_s2] sm:$0xff]  ;;  %v29_v9 = vld [vmem:[%s351_s1 + $0x8] sm:$0xff] }
   0x4   :  { %84 = vmatpush.msra.mxu0 %v26_v1  ;;  %222 = vmatpush.msra.mxu1 %v26_v1  ;;  %v107_v10 = vld [vmem:[%s353_s4 + $0x8] sm:$0xff]  ;;  %v106_v11 = vld [vmem:[%s353_s4] sm:$0xff]  ;;  %v30_v12 = vld [vmem:[%s351_s1 + $0x10] sm:$0xff] }
   0x5   :  { %212 = vmatmul.msk.f32.vlgmr.msra.gmra.mxu0 %vm56_vm0, %v28_v3  ;;  %215 = vmatmul.msk.f32.vlgmr.msra.gmra.mxu1 %vm56_vm0, %v31_v6  ;;  %v109_v18 = vld [vmem:[%s353_s4 + $0x18] sm:$0xff]  ;;  %v108_v21 = vld [vmem:[%s353_s4 + $0x10] sm:$0xff]  ;;  %v177_v27 = vld [vmem:[%s354_s6] sm:$0xff] }
   0x6   :  { %234 = vset.pattern.permute.xlu2 %v237_v2  ;;  %v102_v32 = vld [vmem:[%s355_s3] sm:$0xff]  ;;  %v103_v33 = vld [vmem:[%s355_s3 + $0x8] sm:$0xff]  ;;  %v104_v34 = vld [vmem:[%s355_s3 + $0x10] sm:$0xff] }
   0x7   :  { %127 = vperm.xlu2 %234, %v109_v18   ;;  %v105_v35 = vld [vmem:[%s355_s3 + $0x18] sm:$0xff]  ;;  %v176_v52 = vld [vmem:[%s356_s5] sm:$0xff] }
   0xb   :  { %48 = vperm.xlu0 %232, %v34_v7   ;;  %38 = vperm.xlu1 %233, %v32_v8  }
   0xd   :  { %213 = vmatmul.msk.f32.gmra.mxu0 %vm56_vm0, %v29_v9 }
   0xf   :  { %122 = vperm.xlu2 %234, %v108_v21  }
  0x13   :  { %117 = vperm.xlu0 %232, %v107_v10   ;;  %112 = vperm.xlu1 %233, %v106_v11  }
  0x15   :  { %214 = vmatmul.msk.f32.gmra.mxu0 %vm56_vm0, %v30_v12 }
  0x17   :  { %180 = vperm.xlu2 %234, %v177_v27  }
  0x61   :  { %v128_v36 = vpop.permute.xlu2 %127 }
  0x69   :  { %v123_v38 = vpop.permute.xlu2 %122 }
  0x71   :  { %v181_v53 = vpop.permute.xlu2 %180 }
  0x75   :  { %v54_v13 = vpop.permute.xlu0 %53  ;;  %v44_v19 = vpop.permute.xlu1 %43 }
  0x7d   :  { %v49_v22 = vpop.permute.xlu0 %48  ;;  %v39_v23 = vpop.permute.xlu1 %38 }
  0x82   :  { %v86_v14 = vpop.f32.mrf.mxu0  ;;  %v95_v15 = vpop.f32.mrf.mxu1 }
  0x83   :  { %v96_v16 = vadd.f32 %v95_v15, %v54_v13  ;;  %v87_v28 = vadd.f32 %v86_v14, %v39_v23 }
  0x85   :  { %v101_v17 = vmax.f32 %v96_v16, 0.0  ;;  %v98_v31 = vmax.f32 %v87_v28, 0.0  ;;  %v118_v43 = vpop.permute.xlu0 %117  ;;  %v113_v47 = vpop.permute.xlu1 %112 }
  0x87   :  { %155 = vmatpush.msrb.mxu1 %v101_v17  ;;  %223 = vmatpush.msra.mxu2 %v101_v17 }
  0x88   :  { %224 = vmatpush.msra.mxu3 %v101_v17 }
  0x8a   :  { %v89_v20 = vpop.f32.mrf.mxu0 }
  0x8b   :  { %v90_v25 = vadd.f32 %v89_v20, %v44_v19 }
  0x8d   :  { %v99_v30 = vmax.f32 %v90_v25, 0.0 }
  0x92   :  { %v92_v24 = vpop.f32.mrf.mxu0 }
  0x93   :  { %v93_v26 = vadd.f32 %v92_v24, %v49_v22 }
  0x95   :  { %v100_v29 = vmax.f32 %v93_v26, 0.0 }
  0x97   :  { %156 = vmatpush.msrb.mxu1 %v100_v29  ;;  %225 = vmatpush.msra.mxu2 %v100_v29 }
  0x98   :  { %226 = vmatpush.msra.mxu3 %v100_v29 }
  0x99   :  { %157 = vmatpush.msrb.mxu1 %v99_v30  ;;  %227 = vmatpush.msra.mxu2 %v99_v30 }
  0x9a   :  { %228 = vmatpush.msra.mxu3 %v99_v30 }
  0x9b   :  { %158 = vmatpush.msrb.mxu1 %v98_v31  ;;  %229 = vmatpush.msra.mxu2 %v98_v31 }
  0x9c   :  { %230 = vmatpush.msra.mxu3 %v98_v31  ;;  %216 = vmatmul.msk.f32.vlgmr.msrb.gmra.mxu1 %vm130_vm1, %v102_v32 }
  0x9d   :  { %217 = vmatmul.msk.f32.vlgmr.msra.gmra.mxu2 %vm130_vm1, %v103_v33  ;;  %218 = vmatmul.msk.f32.vlgmr.msra.gmra.mxu3 %vm130_vm1, %v104_v34 }
  0xa5   :  { %219 = vmatmul.msk.f32.gmra.mxu3 %vm130_vm1, %v105_v35 }
 0x119   :  { %v160_v44 = vpop.f32.mrf.mxu1 }
 0x11a   :  { %v161_v48 = vadd.f32 %v160_v44, %v113_v47 }
 0x11c   :  { %v172_v51 = vmax.f32 %v161_v48, 0.0 }
 0x120   :  { %v166_v37 = vpop.f32.mrf.mxu3  ;;  %v163_v39 = vpop.f32.mrf.mxu2 }
 0x121   :  { %v167_v41 = vadd.f32 %v166_v37, %v123_v38  ;;  %v164_v45 = vadd.f32 %v163_v39, %v118_v43 }
 0x123   :  { %v174_v49 = vmax.f32 %v167_v41, 0.0  ;;  %v173_v50 = vmax.f32 %v164_v45, 0.0 }
 0x128   :  { %v169_v40 = vpop.f32.mrf.mxu3 }
 0x129   :  { %v170_v42 = vadd.f32 %v169_v40, %v128_v36 }
 0x12b   :  { %v175_v46 = vmax.f32 %v170_v42, 0.0 }
 0x12d   :  { %198 = vmatpush.msrb.mxu2 %v175_v46 }
 0x12f   :  { %199 = vmatpush.msrb.mxu2 %v174_v49 }
 0x131   :  { %200 = vmatpush.msrb.mxu2 %v173_v50 }
 0x133   :  { %201 = vmatpush.msrb.mxu2 %v172_v51 }
 0x134   :  { %220 = vmatmul.msk.f32.vlgmr.msrb.gmra.mxu2 %vm130_vm1, %v176_v52 }
 0x1b7   :  { %v203_v54 = vpop.f32.mrf.mxu2 }
 0x1b8   :  { %v204_v55 = vadd.f32 %v203_v54, %v181_v53 }
 0x1ba   :  { %235 = vtanh.f32 %v204_v55 }
 0x1c0   :  { %v236_v56 = vpop.eup %235 }
 0x1c1   :  { %207 = vst [vmem:[%s357_s7] sm:$0xff] %v236_v56 }

</bundles_post_ra>
